<compile_context>
chip_gen: v5e
topology: v5e:2x2
jax: 0.10.0
libtpu: 0.0.40
codegen_flags: <defaults>
</compile_context>

<pallas_src>
import functools
from typing import NamedTuple

import jax
import jax.numpy as jnp
from jax.experimental import pallas as pl
from jax.experimental.pallas import tpu as pltpu

F_OUT = 8  # output slab width: lane 0 = y, lane 1 = logabsdet, rest zero


def _round_up(x, m):
    return (x + m - 1) // m * m


def _choose_tiles(b):
    """(batch tile, padded batch): >=2 grid steps when possible (v7x megacore),
    tile <= 1024 rows, padding waste <= one 8-row sublane per tile."""
    b8 = _round_up(max(int(b), 1), 8)
    if b8 <= 8:
        return b8, b8
    n_tiles = max(2, (b8 + 1023) // 1024)
    tb = _round_up((b8 + n_tiles - 1) // n_tiles, 8)
    return tb, tb * n_tiles


# ---------------------------------------------------------------------------
# Fused param-net MLP + conditional affine scalar transform (Pallas kernel)
# ---------------------------------------------------------------------------
def _cond_affine_kernel(packed_ref, w1_ref, b1_ref, w2_ref, b2_ref, out_ref,
                        *, x_lane, inverse):
    """packed_ref : (TB, F)  f32  — lanes [0:D] = context, lane D = x, rest 0.
       w1_ref     : (F, Hp)  bf16 — rows >= D (incl. the x lane) are zero.
       b1_ref     : (1, Hp)  f32
       w2_ref     : (Hp, 8)  bf16 — only cols 0 (shift) / 1 (log_scale) used.
       b2_ref     : (1, 8)   f32
       out_ref    : (TB, 8)  f32  — lane 0 = y, lane 1 = logabsdet, rest 0.
    """
    packed = packed_ref[...]                                  # (TB, F) f32
    x = packed[:, x_lane:x_lane + 1]                          # (TB, 1) exact f32

    # Param-net MLP: bf16 MXU inputs, f32 accumulation.  x never leaks into
    # the MLP because W1's rows >= D are zero.
    h = jnp.dot(packed.astype(jnp.bfloat16), w1_ref[...],
                preferred_element_type=jnp.float32)
    h = jax.nn.relu(h + b1_ref[...])
    params = jnp.dot(h.astype(jnp.bfloat16), w2_ref[...],
                     preferred_element_type=jnp.float32) + b2_ref[...]   # (TB, 8)

    shift = params[:, 0:1]
    log_scale = params[:, 1:2]

    if inverse:
        # solution_transform forward: causal variable -> noise
        y = x * jnp.exp(log_scale) + shift                    # single EUP exp
        logdet = log_scale
    else:
        # solution_transform inverse: noise -> causal variable
        y = (x - shift) * jnp.exp(-log_scale)
        logdet = -log_scale

    lane = jax.lax.broadcasted_iota(jnp.int32, params.shape, 1)
    out = jnp.where(lane == 0, y, jnp.where(lane == 1, logdet, 0.0))
    out_ref[...] = out.astype(out_ref.dtype)


@functools.lru_cache(maxsize=None)
def _build_affine_call(tb, bp, f_in, hp, x_lane, inverse):
    kernel = functools.partial(_cond_affine_kernel, x_lane=x_lane, inverse=inverse)
    batch_in = pl.BlockSpec((tb, f_in), lambda i: (i, 0))
    batch_out = pl.BlockSpec((tb, F_OUT), lambda i: (i, 0))
    resident = lambda shape: pl.BlockSpec(shape, lambda i: (0, 0))  # VMEM-resident weights
    return pl.pallas_call(
        kernel,
        out_shape=jax.ShapeDtypeStruct((bp, F_OUT), jnp.float32),
        grid_spec=pltpu.PrefetchScalarGridSpec(
            num_scalar_prefetch=0,
            grid=(bp // tb,),
            in_specs=[
                batch_in,                 # packed (context | x) — streamed per tile
                resident((f_in, hp)),     # W1 (bf16)
                resident((1, hp)),        # b1 (f32)
                resident((hp, F_OUT)),    # W2 (bf16)
                resident((1, F_OUT)),     # b2 (f32)
            ],
            out_specs=batch_out,
        ),
        compiler_params=pltpu.CompilerParams(
            dimension_semantics=("parallel",),
        ),
    )


class PreparedAffineParams(NamedTuple):
    """Param-net weights padded/cast ONCE at construction time (static)."""
    w1: jax.Array   # (f_in, hp) bf16, rows >= d zero
    b1: jax.Array   # (1, hp)    f32
    w2: jax.Array   # (hp, 8)    bf16
    b2: jax.Array   # (1, 8)     f32
    d: int
    f_in: int
    hp: int


def prepare_affine_params(w1, b1, w2, b2):
    w1 = jnp.asarray(w1, jnp.float32)
    b1 = jnp.asarray(b1, jnp.float32)
    w2 = jnp.asarray(w2, jnp.float32)
    b2 = jnp.asarray(b2, jnp.float32)
    d, h = w1.shape
    f_in = _round_up(d + 1, 8)                 # context lanes + 1 x lane
    hp = _round_up(max(h, 1), 8)               # no 128 round-up: H=64 stays 64
    w1p = jnp.zeros((f_in, hp), jnp.float32).at[:d, :h].set(w1).astype(jnp.bfloat16)
    b1p = jnp.zeros((1, hp), jnp.float32).at[0, :h].set(b1)
    w2p = jnp.zeros((hp, F_OUT), jnp.float32).at[:h, :2].set(w2).astype(jnp.bfloat16)
    b2p = jnp.zeros((1, F_OUT), jnp.float32).at[0, :2].set(b2)
    return PreparedAffineParams(w1p, b1p, w2p, b2p, int(d), int(f_in), int(hp))


def cond_affine_pallas(x, context, prepared: PreparedAffineParams, *, inverse):
    """Pallas-fused conditional affine scalar transform with an MLP param-net."""
    x = jnp.asarray(x, jnp.float32)
    if x.ndim == 1:
        x = x[:, None]
    context = jnp.asarray(context, jnp.float32)
    b, d = context.shape
    if d != prepared.d:
        raise ValueError(f"context dim {d} != param-net dim {prepared.d}")

    tb, bp = _choose_tiles(b)

    # One narrow f32 slab (32 B/row at D=4): lanes [0:d]=context, lane d = x.
    cols = [context, x]
    if prepared.f_in > d + 1:
        cols.append(jnp.zeros((b, prepared.f_in - (d + 1)), jnp.float32))
    packed = jnp.concatenate(cols, axis=1)
    if bp > b:
        packed = jnp.pad(packed, ((0, bp - b), (0, 0)))

    call = _build_affine_call(int(tb), int(bp), prepared.f_in, prepared.hp,
                              prepared.d, bool(inverse))
    out = call(packed, prepared.w1, prepared.b1, prepared.w2, prepared.b2)
    y = out[:b, 0:1]
    logabsdet = out[:b, 1]
    return y, logabsdet


def cond_affine_ref(x, context, params, *, inverse):
    """Pure-JAX f32 reference with identical semantics (for verification)."""
    w1, b1, w2, b2 = params
    x = jnp.asarray(x, jnp.float32)
    if x.ndim == 1:
        x = x[:, None]
    context = jnp.asarray(context, jnp.float32)
    h = jax.nn.relu(context @ w1 + b1)
    params_out = h @ w2 + b2
    shift = params_out[:, 0:1]
    log_scale = params_out[:, 1:2]
    if inverse:
        y = x * jnp.exp(log_scale) + shift
        logdet = log_scale[:, 0]
    else:
        y = (x - shift) * jnp.exp(-log_scale)
        logdet = -log_scale[:, 0]
    return y, logdet


# ---------------------------------------------------------------------------
# CausalMechanism glue (graph recursion + noise randomization), plain JAX
# ---------------------------------------------------------------------------
class CausalMechanism:
    """JAX/Pallas port of ws_crl CausalMechanism.

    `params` is whatever the bound `affine_fn` expects: PreparedAffineParams
    for the Pallas path, the raw (w1, b1, w2, b2) tuple for the reference.
    NOTE: torch.randperm used the global RNG; here an explicit `rng` key is
    threaded through so results are deterministic and comparable.
    """

    def __init__(self, params, component, ancestor_mechanisms, affine_fn):
        self.params = params
        self.component = component
        self.ancestor_mechanisms = ancestor_mechanisms
        self.affine_fn = affine_fn

    def forward(self, inputs, context, noise, rng, computed_noise=None):
        """Noise (and parent causal variables) -> causal variable."""
        sol_ctx = self._compute_context(inputs, context, noise, rng, computed_noise)
        return self.affine_fn(inputs, sol_ctx, self.params, inverse=False)

    def inverse(self, inputs, context, noise, rng, computed_noise=None):
        """Causal variable (and parent causal variables) -> noise."""
        sol_ctx = self._compute_context(inputs, context, noise, rng, computed_noise)
        return self.affine_fn(inputs, sol_ctx, self.params, inverse=True)

    def _compute_context(self, inputs, context, noise, rng, computed_noise):
        rng, k_perm = jax.random.split(rng)
        noise = self._randomize_noise(noise, k_perm)
        if computed_noise is None:
            computed_noise = {}
        for a, mech in sorted(self.ancestor_mechanisms.items()):
            rng, k_a = jax.random.split(rng)
            if a not in computed_noise:
                this_noise, _ = mech.inverse(
                    context[:, a:a + 1], context, noise, k_a,
                    computed_noise=computed_noise)
                computed_noise[a] = this_noise[:, 0]
            noise = noise.at[:, a].set(computed_noise[a])
        return noise

    @staticmethod
    def _randomize_noise(noise, key):
        cols = []
        for k in range(noise.shape[1]):
            key, sub = jax.random.split(key)
            perm = jax.random.permutation(sub, noise.shape[0])
            cols.append(noise[perm, k])
        return jnp.stack(cols, axis=1)


def _make_paramnet(key, d, h):
    k1, k2, k3, k4 = jax.random.split(key, 4)
    w1 = 0.1 * jax.random.normal(k1, (d, h), jnp.float32)
    b1 = 0.05 * jax.random.normal(k2, (h,), jnp.float32)
    w2 = 0.1 * jax.random.normal(k3, (h, 2), jnp.float32)
    b2 = 0.05 * jax.random.normal(k4, (2,), jnp.float32)
    return (w1, b1, w2, b2)


def _build_mechanisms(weights, affine_fn):
    mech0 = CausalMechanism(weights[0], 0, {}, affine_fn)
    mech1 = CausalMechanism(weights[1], 1, {0: mech0}, affine_fn)
    mech2 = CausalMechanism(weights[2], 2, {0: mech0, 1: mech1}, affine_fn)
    return [mech0, mech1, mech2]


if __name__ == "__main__":
    key = jax.random.PRNGKey(0)
    k_w, k_in, k_ctx, k_noise, k_rng = jax.random.split(key, 5)

    B, D, H = 16, 4, 64
    raw_weights = [_make_paramnet(wk, D, H) for wk in jax.random.split(k_w, 3)]
    prepared_weights = [prepare_affine_params(*w) for w in raw_weights]

    inputs = jax.random.normal(k_in, (B, 1), jnp.float32)
    context = jax.random.normal(k_ctx, (B, D), jnp.float32)
    noise = jax.random.normal(k_noise, (B, D), jnp.float32)

    mechs_pl = _build_mechanisms(prepared_weights, cond_affine_pallas)
    mechs_ref = _build_mechanisms(raw_weights, cond_affine_ref)

    # forward (noise -> causal variable) through the mechanism with 2 ancestors
    y_pl, ld_pl = mechs_pl[2].forward(inputs, context, noise, k_rng)
    y_ref, ld_ref = mechs_ref[2].forward(inputs, context, noise, k_rng)
    jax.block_until_ready((y_pl, ld_pl))

    # inverse (causal variable -> noise)
    z_pl, ldi_pl = mechs_pl[2].inverse(inputs, context, noise, k_rng)
    z_ref, ldi_ref = mechs_ref[2].inverse(inputs, context, noise, k_rng)
    jax.block_until_ready((z_pl, ldi_pl))

    # bf16 MXU inputs vs f32 reference -> slightly looser tolerance than pure f32.
    ok = True
    for a, r in [(y_pl, y_ref), (ld_pl, ld_ref), (z_pl, z_ref), (ldi_pl, ldi_ref)]:
        ok &= bool(jnp.allclose(a, r, rtol=2e-2, atol=2e-2))
    if not ok:
        raise SystemExit("mismatch between Pallas kernel and JAX reference")
    print("KERNEL_OK")
</pallas_src>

<mosaic_0001>
module attributes {stable_mosaic.version = 11 : i64} {
  func.func @_cond_affine_kernel(%arg0: i32, %arg1: memref<8x8xf32, #tpu.memory_space<vmem>>, %arg2: memref<8x64xbf16, #tpu.memory_space<vmem>>, %arg3: memref<1x64xf32, #tpu.memory_space<vmem>>, %arg4: memref<64x8xbf16, #tpu.memory_space<vmem>>, %arg5: memref<1x8xf32, #tpu.memory_space<vmem>>, %arg6: memref<8x8xf32, #tpu.memory_space<vmem>>) attributes {dimension_semantics = [#tpu.dimension_semantics<parallel>], iteration_bounds = array<i64: 2>, scalar_prefetch = 0 : i64, scratch_operands = 0 : i64, tpu.core_type = #tpu.core_type<tc>, window_params = [{transform_indices = @transform_0, window_bounds = array<i64: 8, 8>}, {pipeline_mode = #tpu.pipeline_mode<synchronous>, transform_indices = @transform_1, window_bounds = array<i64: 8, 64>}, {pipeline_mode = #tpu.pipeline_mode<synchronous>, transform_indices = @transform_2, window_bounds = array<i64: 1, 64>}, {pipeline_mode = #tpu.pipeline_mode<synchronous>, transform_indices = @transform_3, window_bounds = array<i64: 64, 8>}, {pipeline_mode = #tpu.pipeline_mode<synchronous>, transform_indices = @transform_4, window_bounds = array<i64: 1, 8>}, {transform_indices = @transform_5, window_bounds = array<i64: 8, 8>}]} {
    %c0 = arith.constant 0 : index
    %c0_0 = arith.constant 0 : index
    %0 = vector.load %arg1[%c0, %c0_0] : memref<8x8xf32, #tpu.memory_space<vmem>>, vector<8x8xf32>
    %1 = vector.extract_strided_slice %0 {offsets = [0, 4], sizes = [8, 1], strides = [1, 1]} : vector<8x8xf32> to vector<8x1xf32>
    %2 = arith.truncf %0 : vector<8x8xf32> to vector<8x8xbf16>
    %c0_1 = arith.constant 0 : index
    %c0_2 = arith.constant 0 : index
    %3 = vector.load %arg2[%c0_1, %c0_2] : memref<8x64xbf16, #tpu.memory_space<vmem>>, vector<8x64xbf16>
    %cst = arith.constant dense<0.000000e+00> : vector<8x64xf32>
    %4 = tpu.matmul %2, %3, %cst {dimension_numbers = #tpu.dot_dimension_numbers<[1], [0], [0], [1], [0, 0, 1, 1], [], []>} : vector<8x8xbf16>, vector<8x64xbf16>, vector<8x64xf32> -> vector<8x64xf32>
    %c0_3 = arith.constant 0 : index
    %c0_4 = arith.constant 0 : index
    %5 = vector.load %arg3[%c0_3, %c0_4] : memref<1x64xf32, #tpu.memory_space<vmem>>, vector<1x64xf32>
    %6 = vector.broadcast %5 : vector<1x64xf32> to vector<8x64xf32>
    %7 = arith.addf %4, %6 : vector<8x64xf32>
    %cst_5 = arith.constant 0.000000e+00 : f32
    %8 = vector.broadcast %cst_5 : f32 to vector<8x64xf32>
    %9 = arith.maximumf %7, %8 : vector<8x64xf32>
    %10 = arith.truncf %9 : vector<8x64xf32> to vector<8x64xbf16>
    %c0_6 = arith.constant 0 : index
    %c0_7 = arith.constant 0 : index
    %11 = vector.load %arg4[%c0_6, %c0_7] : memref<64x8xbf16, #tpu.memory_space<vmem>>, vector<64x8xbf16>
    %cst_8 = arith.constant dense<0.000000e+00> : vector<8x8xf32>
    %12 = tpu.matmul %10, %11, %cst_8 {dimension_numbers = #tpu.dot_dimension_numbers<[1], [0], [0], [1], [0, 0, 1, 1], [], []>} : vector<8x64xbf16>, vector<64x8xbf16>, vector<8x8xf32> -> vector<8x8xf32>
    %c0_9 = arith.constant 0 : index
    %c0_10 = arith.constant 0 : index
    %13 = vector.load %arg5[%c0_9, %c0_10] : memref<1x8xf32, #tpu.memory_space<vmem>>, vector<1x8xf32>
    %14 = vector.broadcast %13 : vector<1x8xf32> to vector<8x8xf32>
    %15 = arith.addf %12, %14 : vector<8x8xf32>
    %16 = vector.extract_strided_slice %15 {offsets = [0, 0], sizes = [8, 1], strides = [1, 1]} : vector<8x8xf32> to vector<8x1xf32>
    %17 = vector.extract_strided_slice %15 {offsets = [0, 1], sizes = [8, 1], strides = [1, 1]} : vector<8x8xf32> to vector<8x1xf32>
    %18 = math.exp %17 : vector<8x1xf32>
    %19 = arith.mulf %1, %18 : vector<8x1xf32>
    %20 = arith.addf %19, %16 : vector<8x1xf32>
    %21 = tpu.iota {dimensions = array<i32: 1>} : vector<8x8xi32>
    %c0_i32 = arith.constant 0 : i32
    %22 = vector.broadcast %c0_i32 : i32 to vector<8x8xi32>
    %23 = arith.cmpi eq, %21, %22 : vector<8x8xi32>
    %c1_i32 = arith.constant 1 : i32
    %24 = vector.broadcast %c1_i32 : i32 to vector<8x8xi32>
    %25 = arith.cmpi eq, %21, %24 : vector<8x8xi32>
    %cst_11 = arith.constant 0.000000e+00 : f32
    %26 = vector.shape_cast %17 : vector<8x1xf32> to vector<8x1xf32>
    %27 = vector.broadcast %26 : vector<8x1xf32> to vector<8x8xf32>
    %28 = vector.broadcast %cst_11 : f32 to vector<8x8xf32>
    %29 = arith.select %25, %27, %28 : vector<8x8xi1>, vector<8x8xf32>
    %30 = vector.shape_cast %20 : vector<8x1xf32> to vector<8x1xf32>
    %31 = vector.broadcast %30 : vector<8x1xf32> to vector<8x8xf32>
    %32 = arith.select %23, %31, %29 : vector<8x8xi1>, vector<8x8xf32>
    %c0_12 = arith.constant 0 : index
    %c0_13 = arith.constant 0 : index
    %33 = vector.load %arg6[%c0_12, %c0_13] : memref<8x8xf32, #tpu.memory_space<vmem>>, vector<8x8xf32>
    tpu.vector_store %arg6[%c0_12, %c0_13], %32 {strides = array<i32>} : memref<8x8xf32, #tpu.memory_space<vmem>>, vector<8x8xf32>,
    return
  }
  func.func @transform_0(%arg0: i32) -> (i32, i32) {
    %c0_i32 = arith.constant 0 : i32
    %c0_i32_0 = arith.constant 0 : i32
    return %arg0, %c0_i32 : i32, i32
  }
  func.func @transform_1(%arg0: i32) -> (i32, i32) {
    %c0_i32 = arith.constant 0 : i32
    %c0_i32_0 = arith.constant 0 : i32
    %c0_i32_1 = arith.constant 0 : i32
    return %c0_i32, %c0_i32_0 : i32, i32
  }
  func.func @transform_2(%arg0: i32) -> (i32, i32) {
    %c0_i32 = arith.constant 0 : i32
    %c0_i32_0 = arith.constant 0 : i32
    %c0_i32_1 = arith.constant 0 : i32
    return %c0_i32, %c0_i32_0 : i32, i32
  }
  func.func @transform_3(%arg0: i32) -> (i32, i32) {
    %c0_i32 = arith.constant 0 : i32
    %c0_i32_0 = arith.constant 0 : i32
    %c0_i32_1 = arith.constant 0 : i32
    return %c0_i32, %c0_i32_0 : i32, i32
  }
  func.func @transform_4(%arg0: i32) -> (i32, i32) {
    %c0_i32 = arith.constant 0 : i32
    %c0_i32_0 = arith.constant 0 : i32
    %c0_i32_1 = arith.constant 0 : i32
    return %c0_i32, %c0_i32_0 : i32, i32
  }
  func.func @transform_5(%arg0: i32) -> (i32, i32) {
    %c0_i32 = arith.constant 0 : i32
    %c0_i32_0 = arith.constant 0 : i32
    return %arg0, %c0_i32 : i32, i32
  }
}

</mosaic_0001>

<bundles_post_ra>
// kernel: tpu_custom_call.1
= control target key start
LH: loop header
LB: loop body
LE: loop exit
PB: predicated region body
PF: predicated region fallthrough
CT: control target
= control target key end

     0   :  { %s477_s18 = smov 0   ;;  %s524_s0 = inlined_call_operand.vmem [shape: f32[16,8], index: 0, kind: input, shape index: {}]   ;;  %s525_s1 = inlined_call_operand.vmem [shape: bf16[8,64], index: 1, kind: input, shape index: {}]   ;;  %s526_s2 = inlined_call_operand.vmem [shape: f32[1,64], index: 2, kind: input, shape index: {}]   ;;  %s527_s3 = inlined_call_operand.vmem [shape: bf16[64,8], index: 3, kind: input, shape index: {}]   ;;  %s528_s4 = inlined_call_operand.vmem [shape: f32[1,8], index: 4, kind: input, shape index: {}]   ;;  %s529_s5 = inlined_call_operand.vmem [shape: f32[16,8], index: 5, kind: output, shape index: {}]  }
   0x1 LB: > { %s385_s19 = sadd.s32 4294967295, %s441_s18   ;;  %p389_p0 = scmp.ge.s32.totalorder %s441_s18, 1  ;;  %s441_s18 = sphi %s477_s18, %s15_s18  }
   0x2   : > { %p186_p1 = scmp.lt.s32.totalorder %s441_s18, 3 }
   0x4   : > { %p187_p2 = pnand %p389_p0, %p186_p1 }
   0x5   : > { %p212_p3 = scmp.lt.s32.totalorder (!%p187_p2), %s385_s19, 1  ;;  %s444_s13 = smov (!%p187_p2), 3  }
   0x6   : > { %190 = sbr.rel (%p187_p2) target bundleno = 528 (0x210), region = 40  ;;  %s445_s14 = smov (!%p187_p2), 4  }
   0xb   : > { %v223_v0 = vld [vmem:[%s525_s1] sm:$0xf]  ;;  %vm232_vm0 = vcmask 1043456   ;;  %v415_v1 = vld [vmem:[%s527_s3 + $0x18] sm:$0xff]  ;;  %s531_s19 = smov (!%p212_p3, %s385_s19), 1  ;;  %v414_v3 = vld [vmem:[%s527_s3 + $0x10] sm:$0xff]  ;;  %v316_v26 = vlaneseq }
   0xc   : > { %v234_v2 = vsel %vm232_vm0, %v223_v0, 0  ;;  %295 = vmatpush.bf16.msra.mxu1 %v415_v1  ;;  %s390_s26 = sshll.u32 %s531_s19, 3  ;;  %vm228_vm1 = vcmask 64512   ;;  %v413_v6 = vld [vmem:[%s527_s3 + $0x8] sm:$0xff]  ;;  %v412_v7 = vld [vmem:[%s527_s3] sm:$0xff]  ;;  %vm287_vm2 = vcmask 523264  }
   0xd   : > { %243 = vmatpush.bf16.msra.mxu0 %v234_v2  ;;  %s215_s29 = scalar_lea.vmem %s524_s0, %s390_s26  ;;  %v431_v8 = vld [vmem:[%s526_s2] ss:$0 sm:$0xff]  ;;  %v443_v14 = vmov 1   ;;  %v446_v21 = vmov 4   ;;  %v317_v28 = vand.u32 127, %v316_v26  ;;  %s219_s17 = scalar_lea.vmem %s529_s5, %s390_s26 }
   0xe   : > { %v221_v4 = vld [vmem:[%s215_s29] sm:$0xff]  ;;  %428 = vset.pattern.permute.xlu1 %v443_v14  ;;  %430 = vset.pattern.permute.xlu0 %v446_v21 }
   0xf   : > { %v222_v5 = vpack.c.bf16 %v221_v4, %v221_v4  ;;  %v432_v15 = vld [vmem:[%s528_s4] ss:$0 sm:$0xff]  ;;  %vm319_vm3 = vcmp.eq.s32.totalorder %v317_v28, 1  ;;  %vm318_vm4 = vcmp.eq.s32.totalorder %v317_v28, 0 }
  0x10   : > { %296 = vmatpush.bf16.msra.mxu1 %v414_v3 }
  0x11   : > { %392 = vmatmul.msk.bf16.vlgmr.msra.gmra.mxu0 %vm228_vm1, %v222_v5 }
  0x14   : > { %297 = vmatpush.bf16.msra.mxu1 %v413_v6 }
  0x18   : > { %298 = vmatpush.bf16.msra.mxu1 %v412_v7 }
  0x8e   : > { %v245_v9 = vpop.f32.mrf.mxu0 }
  0x8f   : > { %v246_v10 = vadd.f32 %v431_v8, %v245_v9 }
  0x91   : > { %v249_v11 = vmax.f32 %v246_v10, 0.0 }
  0x93   : > { %v250_v12 = vpack.c.bf16 %v249_v11, %v249_v11 }
  0x95   : > { %409 = vmatmul.msk.bf16.vlgmr.msra.gmra.mxu1 %vm287_vm2, %v250_v12 }
  0x96   : > { %v247_v13 = vpop.f32.mrf.mxu0 }
 0x112   : > { %v300_v16 = vpop.f32.mrf.mxu1 }
 0x113   : > { %v301_v17 = vadd.f32 %v432_v15, %v300_v16 }
 0x115   : > { %v304_v18 = vmul.f32 1.442695, %v301_v17  ;;  %321 = vperm.xlu1 %428, %v301_v17  }
 0x117   : > { %433 = vpow2.f32 %v304_v18 }
 0x11a   : > { %v302_v19 = vpop.f32.mrf.mxu1 }
 0x11d   : > { %v434_v20 = vpop.eup %433  ;;  %429 = vset.pattern.permute.xlu1 %v446_v21 }
 0x11e   : > { %307 = vrot.lane.b32.xlu0 %v434_v20, %s444_s13 }
 0x126   : > { %312 = vrot.lane.b32.xlu0 %v301_v17, %s445_s14 }
 0x187   : > { %v322_v27 = vpop.permute.xlu1 %321 }
 0x188   : > { %v324_v29 = vsel %vm319_vm3, %v322_v27, 0.0 }
 0x190   : > { %v308_v22 = vpop.permute.xlu0 %307 }
 0x191   : > { %v310_v23 = vmul.f32 %v308_v22, %v221_v4 }
 0x198   : > { %v313_v24 = vpop.permute.xlu0 %312 }
 0x199   : > { %v315_v25 = vadd.f32 %v313_v24, %v310_v23 }
 0x19b   : > { %327 = vperm.xlu1 %429, %v315_v25  }
 0x20d   : > { %v328_v30 = vpop.permute.xlu1 %327 }
 0x20e   : > { %v330_v31 = vsel %vm318_vm4, %v328_v30, %v324_v29 }
 0x20f   : > { %331 = vst.msk [vmem:[%s219_s17] sm:$0xff] %vm228_vm1, %v330_v31 }
 0x210 PF: > { %s15_s18 = sadd.s32 1, %s441_s18  }
 0x211   : > { %p12_p4 = scmp.ge.s32.totalorder %s15_s18, 4  }
 0x213   :  { %14 = sbr.rel (!%p12_p4) target bundleno = 1 (0x1), region = 70 }

</bundles_post_ra>
